<compile_context>
chip_gen: v6e
topology: v6e:2x2x1
jax: 0.10.0
libtpu: 0.0.40
codegen_flags: <defaults>
</compile_context>

<pallas_src>
import functools

import jax
import jax.numpy as jnp
from jax.experimental import pallas as pl
from jax.experimental.pallas import tpu as pltpu


def _rmsnorm_kernel(x_ref, g_ref, o_ref, *, eps, inv_d):
    """One row tile. Rows are independent; the mean uses the true d_model (inv_d).

    NOTE: the ragged last grid block contains padding rows whose rsqrt may be
    garbage/Inf -- harmless because their writeback is masked, but do NOT add any
    cross-row reduction here that would ingest them.
    """
    x = x_ref[...].astype(jnp.float32)                      # (row_tile, d_pad)
    # Lane-padding columns are zero, so they do not perturb the sum of squares.
    ss = jnp.sum(x * x, axis=-1, keepdims=True)             # (row_tile, 1), XLU
    inv_rms = jax.lax.rsqrt(ss * inv_d + eps)               # EUP rsqrt
    g = g_ref[...].astype(jnp.float32)                      # (1, d_pad), resident
    # Re-read x for the scale pass so the upcast copy above is not live across the
    # reduction (trims one full-tile f32 temporary -- matters on v7x's 64 MiB VMEM).
    o_ref[...] = (x_ref[...].astype(jnp.float32) * inv_rms * g).astype(o_ref.dtype)


def _vmem_capacity_bytes():
    try:
        return int(pltpu.get_tpu_info().vmem_capacity_bytes)
    except Exception:
        return 64 << 20  # conservative fallback = v7x per-TC VMEM


def _is_v7():
    try:
        return "v7" in jax.devices()[0].device_kind.lower()
    except Exception:
        return False


def _pick_row_tile(n_rows, d_pad, dtype, vmem_budget):
    """Largest sublane-aligned row tile whose resident footprint fits the budget,
    byte-capped so the input tile is ~8 MiB (well past the 2 MiB threshold where
    per-grid-step overhead stops mattering)."""
    itemsize = jnp.dtype(dtype).itemsize
    # Sublane packing: 8 rows for 32-bit, 16 for 16-bit, 32 for 8-bit dtypes.
    sublane = {4: 8, 2: 16, 1: 32}.get(itemsize, 8)
    per_row_in = d_pad * itemsize
    # Resident bytes per row: double-buffered input + output tiles plus up to
    # three full-tile f32 temporaries from the upcasted intermediates.
    per_row_total = d_pad * (2 * itemsize + 2 * itemsize + 3 * 4)
    rows_budget = max(sublane, vmem_budget // per_row_total)
    rows_8mib = max(sublane, (8 << 20) // per_row_in)       # ~8 MiB input tile cap
    row_tile = min(rows_budget, rows_8mib)
    row_tile = max(sublane, (row_tile // sublane) * sublane)
    padded_rows = ((n_rows + sublane - 1) // sublane) * sublane
    return int(min(row_tile, padded_rows))


def rmsnorm(x, g, *, eps=1e-5, row_tile=None):
    """x: (batch, seq, d_model), g: (d_model,). Returns same shape/dtype as x."""
    batch, seq, d_model = x.shape
    n_rows = batch * seq
    itemsize = jnp.dtype(x.dtype).itemsize
    g_itemsize = jnp.dtype(g.dtype).itemsize

    # Lane-dense guarantee: pad d_model to a multiple of 128 so stores take the
    # unmasked vst path.  The mean uses the true d_model; padded gain columns are
    # zero, so padded output columns are zero and get sliced off below.
    d_pad = max(128, ((d_model + 127) // 128) * 128)
    x2d = x.reshape(n_rows, d_model)
    g2d = g.reshape(1, d_model)
    if d_pad != d_model:
        x2d = jnp.pad(x2d, ((0, 0), (0, d_pad - d_model)))
        g2d = jnp.pad(g2d, ((0, 0), (0, d_pad - d_model)))

    vmem_cap = _vmem_capacity_bytes()
    if row_tile is None:
        row_tile = _pick_row_tile(n_rows, d_pad, x.dtype, int(vmem_cap * 0.65))

    n_steps = pl.cdiv(n_rows, row_tile)
    grid = (n_steps,)

    # Explicit scoped-VMEM limit from the real footprint (+25% headroom), capped
    # generation-aware at 75% of physical VMEM.  v5e needs the explicit limit: its
    # default scoped VMEM is only 16 MiB.
    tile_elems = row_tile * d_pad
    footprint = (4 * tile_elems * itemsize        # double-buffered in + out tiles
                 + 3 * tile_elems * 4             # live f32 intermediates (upper bound)
                 + 2 * d_pad * g_itemsize)        # resident gain vector
    vmem_limit = int(min(int(vmem_cap * 0.75), max(16 << 20, int(footprint * 1.25))))

    # v7x has 2 TensorCores/chip, each with its own DMA path: shard the row grid
    # across them.  Plain "parallel" elsewhere (single-TC chips).
    if _is_v7() and n_steps >= 2 and hasattr(pltpu, "CORE_PARALLEL"):
        dim_sem = (pltpu.CORE_PARALLEL,)
    else:
        dim_sem = ("parallel",)

    # Optional deeper input pipelining when the tile ended up tiny but the grid is
    # long (hides DMA issue latency); rarely triggers with the byte-based tiling.
    x_spec_kwargs = {}
    if row_tile * d_pad * itemsize < (2 << 20) and n_steps >= 4:
        x_spec_kwargs["pipeline_mode"] = pl.Buffered(3)

    cost = pl.CostEstimate(
        flops=4 * n_rows * d_pad,
        transcendentals=n_rows,
        bytes_accessed=2 * n_rows * d_pad * itemsize + d_pad * g_itemsize,
    )

    out2d = pl.pallas_call(
        functools.partial(_rmsnorm_kernel, eps=eps, inv_d=1.0 / d_model),
        out_shape=jax.ShapeDtypeStruct((n_rows, d_pad), x.dtype),
        grid_spec=pltpu.PrefetchScalarGridSpec(
            num_scalar_prefetch=0,
            grid=grid,
            in_specs=[
                pl.BlockSpec((row_tile, d_pad), lambda i: (i, 0), **x_spec_kwargs),
                pl.BlockSpec((1, d_pad), lambda i: (0, 0)),  # gain stays VMEM-resident
            ],
            out_specs=pl.BlockSpec((row_tile, d_pad), lambda i: (i, 0)),
        ),
        compiler_params=pltpu.CompilerParams(
            dimension_semantics=dim_sem,
            vmem_limit_bytes=vmem_limit,
        ),
        cost_estimate=cost,
    )(x2d, g2d)

    if d_pad != d_model:
        out2d = out2d[:, :d_model]
    return out2d.reshape(batch, seq, d_model)


def rmsnorm_ref(x, g, eps=1e-5):
    xf = x.astype(jnp.float32)
    rms = jnp.sqrt(jnp.mean(xf * xf, axis=-1, keepdims=True) + eps)
    return (xf / rms * g.astype(jnp.float32)).astype(x.dtype)


if __name__ == "__main__":
    # Small demo shapes consistent with the module's (batch, seq, d_model) input;
    # d_model kept 128-aligned so the demo exercises the lane-dense fast path.
    batch, seq, d_model = 2, 8, 128
    eps = 1e-5

    key = jax.random.PRNGKey(0)
    kx, kg = jax.random.split(key)

    x = jax.random.normal(kx, (batch, seq, d_model), dtype=jnp.float32)
    # Deterministic init matching nn.init.trunc_normal_(mean=0, std=1, a=-3, b=3).
    g = jax.random.truncated_normal(kg, -3.0, 3.0, (d_model,), dtype=jnp.float32)

    out = rmsnorm(x, g, eps=eps)
    jax.block_until_ready(out)

    ref = rmsnorm_ref(x, g, eps=eps)
    assert out.shape == x.shape and out.dtype == x.dtype
    err = float(jnp.max(jnp.abs(out.astype(jnp.float32) - ref.astype(jnp.float32))))
    assert err < 1e-5, err

    print("KERNEL_OK")
</pallas_src>

<mosaic_0001>
module attributes {stable_mosaic.version = 11 : i64} {
  func.func @_rmsnorm_kernel(%arg0: i32, %arg1: memref<16x128xf32, #tpu.memory_space<vmem>>, %arg2: memref<1x128xf32, #tpu.memory_space<vmem>>, %arg3: memref<16x128xf32, #tpu.memory_space<vmem>>) attributes {dimension_semantics = [#tpu.dimension_semantics<parallel>], iteration_bounds = array<i64: 1>, scalar_prefetch = 0 : i64, scratch_operands = 0 : i64, tpu.core_type = #tpu.core_type<tc>, window_params = [{transform_indices = @transform_0, window_bounds = array<i64: 16, 128>}, {pipeline_mode = #tpu.pipeline_mode<synchronous>, transform_indices = @transform_1, window_bounds = array<i64: 1, 128>}, {transform_indices = @transform_2, window_bounds = array<i64: 16, 128>}]} {
    %c0 = arith.constant 0 : index
    %c0_0 = arith.constant 0 : index
    %0 = vector.load %arg1[%c0, %c0_0] : memref<16x128xf32, #tpu.memory_space<vmem>>, vector<16x128xf32>
    %1 = arith.mulf %0, %0 : vector<16x128xf32>
    %cst = arith.constant dense<0.000000e+00> : vector<16xf32>
    %2 = vector.multi_reduction <add>, %1, %cst [1] : vector<16x128xf32> to vector<16xf32>
    %3 = vector.shape_cast %2 : vector<16xf32> to vector<16x1xf32>
    %cst_1 = arith.constant 7.812500e-03 : f32
    %4 = vector.broadcast %cst_1 : f32 to vector<16x1xf32>
    %5 = arith.mulf %3, %4 : vector<16x1xf32>
    %cst_2 = arith.constant 9.99999974E-6 : f32
    %6 = vector.broadcast %cst_2 : f32 to vector<16x1xf32>
    %7 = arith.addf %5, %6 : vector<16x1xf32>
    %8 = math.rsqrt %7 : vector<16x1xf32>
    %c0_3 = arith.constant 0 : index
    %c0_4 = arith.constant 0 : index
    %9 = vector.load %arg2[%c0_3, %c0_4] : memref<1x128xf32, #tpu.memory_space<vmem>>, vector<1x128xf32>
    %c0_5 = arith.constant 0 : index
    %c0_6 = arith.constant 0 : index
    %10 = vector.load %arg1[%c0_5, %c0_6] : memref<16x128xf32, #tpu.memory_space<vmem>>, vector<16x128xf32>
    %11 = vector.broadcast %8 : vector<16x1xf32> to vector<16x128xf32>
    %12 = arith.mulf %10, %11 : vector<16x128xf32>
    %13 = vector.broadcast %9 : vector<1x128xf32> to vector<16x128xf32>
    %14 = arith.mulf %12, %13 : vector<16x128xf32>
    %c0_7 = arith.constant 0 : index
    %c0_8 = arith.constant 0 : index
    %15 = vector.load %arg3[%c0_7, %c0_8] : memref<16x128xf32, #tpu.memory_space<vmem>>, vector<16x128xf32>
    tpu.vector_store %arg3[%c0_7, %c0_8], %14 {strides = array<i32>} : memref<16x128xf32, #tpu.memory_space<vmem>>, vector<16x128xf32>,
    return
  }
  func.func @transform_0(%arg0: i32) -> (i32, i32) {
    %c0_i32 = arith.constant 0 : i32
    %c0_i32_0 = arith.constant 0 : i32
    return %arg0, %c0_i32 : i32, i32
  }
  func.func @transform_1(%arg0: i32) -> (i32, i32) {
    %c0_i32 = arith.constant 0 : i32
    %c0_i32_0 = arith.constant 0 : i32
    %c0_i32_1 = arith.constant 0 : i32
    return %c0_i32, %c0_i32_0 : i32, i32
  }
  func.func @transform_2(%arg0: i32) -> (i32, i32) {
    %c0_i32 = arith.constant 0 : i32
    %c0_i32_0 = arith.constant 0 : i32
    return %arg0, %c0_i32 : i32, i32
  }
}

</mosaic_0001>

<bundles_post_ra>
// kernel: tpu_custom_call.1
= control target key start
LH: loop header
LB: loop body
LE: loop exit
PB: predicated region body
PF: predicated region fallthrough
CT: control target
= control target key end

     0   :  { %7 = vsyncpa [#allocation3], 0  ;;  %s157_s0 = inlined_call_operand.hbm [shape: f32[16,128], index: 0, kind: input, shape index: {}]   ;;  %s158_s1 = inlined_call_operand.vmem [shape: f32[1,128], index: 1, kind: input, shape index: {}]   ;;  %s159_s2 = inlined_call_operand.hbm [shape: f32[16,128], index: 2, kind: output, shape index: {}]  }
   0x1   :  { %8 = vsyncpa [#allocation4], 0  ;;  %s123_s9 = smov [#allocation2]  }
   0x2   :  { %s14_s10 = sshll.u32 %s123_s9, 4  ;;  %s15_s10 = int_to_ptr.vmem [resolvable:$true] %s14_s10 }
   0x3   :  { %s87_s11 = scalar_lea.vmem %s15_s10, 256  ;;  %p92_p1 = scmp.lt.s32.totalorder %s15_s10, %s15_s10 }
   0x4   :  { %p88_p0 = scmp.ne.s32.totalorder %s15_s10, %s87_s11  ;;  %p93_p2 = scmp.lt.s32.totalorder %s87_s11, %s87_s11 }
   0x6   :  { %p94_p3 = por %p93_p2, %p92_p1 }
   0x8   :  { %p95_p4 = pnand %p94_p3, %p88_p0 }
   0xa   :  { %98 = shalt.err (!%p95_p4)
}
   0xb   :  { %s124_s12 = smov 128   ;;  %s125_s13 = smov 8  }
   0xc   :  { %20 = dma.hbm_to_vmem [thread:$0]  %s157_s0, 256, %s15_s10, [#allocation3], %s124_s12, %s124_s12, %s125_s13  }
   0xd   :  { %119 = dma.done.wait [#allocation3], 256  }
   0xe   :  { %120 = vsyncadd [#allocation3], 4294967040  ;;  %v26_v0 = vld [vmem:[#allocation2] sm:$0xff]  ;;  %v27_v1 = vld [vmem:[#allocation2 + $0x8] sm:$0xff]  ;;  %s126_s0 = smov [#allocation5]  }
   0xf   :  { %v28_v2 = vmul.f32 %v26_v0, %v26_v0  ;;  %v29_v3 = vmul.f32 %v27_v1, %v27_v1  ;;  %v70_v11 = vld [vmem:[%s158_s1] ss:$0 sm:$0xff]  ;;  %s58_s18 = sshll.u32 %s126_s0, 4  ;;  %s59_s18 = int_to_ptr.vmem [resolvable:$true] %s58_s18 }
  0x10   :  { %s99_s19 = scalar_lea.vmem %s59_s18, 256  ;;  %p104_p6 = scmp.lt.s32.totalorder %s59_s18, %s59_s18 }
  0x11   :  { %30 = vadd.xlane.f32.xlu0 %v28_v2  ;;  %p100_p5 = scmp.ne.s32.totalorder %s59_s18, %s99_s19  ;;  %p105_p7 = scmp.lt.s32.totalorder %s99_s19, %s99_s19 }
  0x13   :  { %p106_p8 = por %p105_p7, %p104_p6 }
  0x15   :  { %32 = vadd.xlane.f32.xlu0 %v29_v3  ;;  %p107_p9 = pnand %p106_p8, %p100_p5 }
  0x9a   :  { %v31_v4 = vpop.xlane.xlu0 %30 }
  0x9b   :  { %v34_v5 = vmul.f32 0.0078125, %v31_v4 }
  0x9d   :  { %v36_v6 = vadd.f32 1e-05, %v34_v5 }
  0x9e   :  { %v33_v7 = vpop.xlane.xlu0 %32 }
  0x9f   :  { %75 = vrsqrt.f32 %v36_v6  ;;  %v35_v8 = vmul.f32 0.0078125, %v33_v7 }
  0xa1   :  { %v37_v9 = vadd.f32 1e-05, %v35_v8 }
  0xa3   :  { %77 = vrsqrt.f32 %v37_v9 }
  0xac   :  { %v76_v10 = vpop.eup %75 }
  0xad   :  { %v41_v12 = vmul.f32 %v76_v10, %v26_v0 }
  0xaf   :  { %v49_v13 = vmul.f32 %v70_v11, %v41_v12 }
  0xb0   :  { %v78_v14 = vpop.eup %77 }
  0xb1   :  { %v42_v15 = vmul.f32 %v78_v14, %v27_v1  ;;  %51 = vst [vmem:[#allocation5] sm:$0xff] %v49_v13 }
  0xb3   :  { %v50_v16 = vmul.f32 %v70_v11, %v42_v15 }
  0xb5   :  { %52 = vst [vmem:[#allocation5 + $0x8] sm:$0xff] %v50_v16 }
  0xb6   :  { %110 = shalt.err (!%p107_p9)
}
  0xb7   :  { %64 = dma.vmem_to_hbm [thread:$0]  %s59_s18, 256, %s159_s2, [#allocation4], %s124_s12, %s124_s12, %s125_s13  }
  0xb8   :  { %121 = dma.done.wait [#allocation4], 256  }
  0xb9   :  { %122 = vsyncadd [#allocation4], 4294967040 }
  0xba   :  { %68 = vsyncpa [#allocation3], 1 }
  0xbb   :  { %69 = vsyncpa [#allocation4], 1 }

</bundles_post_ra>
